<compile_context>
chip_gen: v7x
topology: tpu7x:2x2x1
jax: 0.10.0
libtpu: 0.0.40
codegen_flags: <defaults>
</compile_context>

<pallas_src>
import functools

import jax
import jax.numpy as jnp
import numpy as np
from jax.experimental import pallas as pl
from jax.experimental.pallas import tpu as pltpu

_LANE = 128
_TARGET_BLOCK_BYTES = 4 * 1024 * 1024   # per block; ~4x this in VMEM (in+out, double-buffered)


# --------------------------------- kernel ------------------------------------
def _drop_path_scale_kernel(x_ref, s_ref, o_ref):
    """o = x * scale, where scale is a per-row f32 factor in {0, 1/keep_prob}."""
    x = x_ref[...].astype(jnp.float32)         # keep all math in f32 (safe on v5e)
    o_ref[...] = (x * s_ref[...]).astype(o_ref.dtype)


# ------------------------------ tile selection --------------------------------
def _choose_tiles(b, f, itemsize):
    # Sublane packing: f32 -> 8, bf16 -> 16, int8/fp8 -> 32 rows per native tile.
    row_pack = max(8, 32 // max(1, itemsize))

    # Feature tile: full extent if it fits the budget, else the largest lane-dense
    # (multiple-of-128) tile; the ragged tail is handled by a partial tail block.
    max_fc = max(_LANE, _TARGET_BLOCK_BYTES // (row_pack * itemsize))
    fc = f if f <= max_fc else (max_fc // _LANE) * _LANE

    # Row tile: as many rows as fit the byte budget, multiple of row_pack
    # (or the full row extent, which is always a legal block dim).
    max_rows = max(1, _TARGET_BLOCK_BYTES // max(1, fc * itemsize))
    if max_rows >= b:
        block_rows = b
    else:
        block_rows = min(b, max(row_pack, (max_rows // row_pack) * row_pack))

    # v7x megacore: if the whole grid collapsed to one block, split rows in two
    # so both TensorCores get work (harmless single-TC no-op on v5e/v6e).
    n_blocks = (-(-b // block_rows)) * (-(-f // fc))
    if n_blocks == 1 and b >= 2 * row_pack:
        half = -(-b // 2)
        block_rows = min(b, -(-half // row_pack) * row_pack)

    return block_rows, fc


# -------------------------------- wrapper -------------------------------------
def drop_path(x, drop_prob: float = 0.1, *, training: bool = False, seed: int = 0):
    """Pallas TPU implementation of drop_path() (stochastic depth)."""
    if drop_prob == 0.0 or not training:
        return x                                   # identity, exactly like the reference
    if not (0.0 < drop_prob < 1.0):
        raise ValueError(f"drop_prob must be in [0, 1), got {drop_prob}")
    keep_prob = 1.0 - float(drop_prob)

    orig_shape = x.shape
    b = int(orig_shape[0])
    f = int(np.prod(orig_shape[1:])) if x.ndim > 1 else 1
    x2 = x.reshape(b, f)                           # row-major flatten: free (no copy)

    # Per-sample keep mask and 1/keep_prob rescale: only B scalars, negligible next
    # to the HBM-bound body, deterministic for a given `seed`.
    key = jax.random.PRNGKey(seed)
    u = jax.random.uniform(key, (b, 1), dtype=jnp.float32)
    scale = jnp.floor(jnp.float32(keep_prob) + u) * jnp.float32(1.0 / keep_prob)

    block_rows, fc = _choose_tiles(b, f, x2.dtype.itemsize)
    grid = (pl.cdiv(b, block_rows), pl.cdiv(f, fc))

    out = pl.pallas_call(
        _drop_path_scale_kernel,
        out_shape=jax.ShapeDtypeStruct((b, f), x2.dtype),
        grid=grid,
        in_specs=[
            pl.BlockSpec((block_rows, fc), lambda i, j: (i, j)),   # activations
            pl.BlockSpec((block_rows, 1), lambda i, j: (i, 0)),    # per-row scale
        ],
        out_specs=pl.BlockSpec((block_rows, fc), lambda i, j: (i, j)),
        compiler_params=pltpu.CompilerParams(
            dimension_semantics=("parallel", "parallel")),
    )(x2, scale)

    return out.reshape(orig_shape)


class DropPath:
    """Pallas equivalent of the PyTorch DropPath module (drop_prob=0.1 by default)."""

    def __init__(self, drop_prob: float = 0.1):
        self.drop_prob = drop_prob
        self.training = False                      # eval() semantics by default

    def train(self):
        self.training = True
        return self

    def eval(self):
        self.training = False
        return self

    def __call__(self, x, *, seed: int = 0):
        return drop_path(x, self.drop_prob, training=self.training, seed=seed)


# --------------------------------- driver -------------------------------------
def _check_droppath(x, out, keep_prob, rtol=1e-6, atol=1e-6):
    o = np.asarray(out, dtype=np.float32).reshape(x.shape[0], -1)
    r = np.asarray(x, dtype=np.float32).reshape(x.shape[0], -1)
    for bi in range(x.shape[0]):
        kept = np.allclose(o[bi], r[bi] / keep_prob, rtol=rtol, atol=atol)
        dropped = np.allclose(o[bi], 0.0, atol=atol)
        assert kept or dropped, f"sample {bi}: not a valid per-sample DropPath output"


if __name__ == "__main__":
    key = jax.random.PRNGKey(0)
    drop_prob = 0.1
    keep_prob = 1.0 - drop_prob

    # Primary shape implied by the module usage: (B, C, H, W).
    x = jax.random.normal(key, (2, 4, 16, 16), jnp.float32)

    # 1) eval mode: DropPath is the identity (matches the PyTorch module default).
    mod = DropPath(drop_prob)
    out_eval = mod(x)
    jax.block_until_ready(out_eval)
    assert out_eval.shape == x.shape and out_eval.dtype == x.dtype
    np.testing.assert_allclose(np.asarray(out_eval), np.asarray(x))

    # 2) training mode: per-sample stochastic depth with the 1/keep_prob rescale.
    out_train = drop_path(x, drop_prob, training=True, seed=0)
    jax.block_until_ready(out_train)
    assert out_train.shape == x.shape and out_train.dtype == x.dtype
    _check_droppath(x, out_train, keep_prob)

    # 3) ragged shape (non-multiple of 8/128 dims) exercising row tiling + tail blocks.
    x_ragged = jax.random.normal(jax.random.PRNGKey(1), (20, 3, 37, 37), jnp.float32)
    out_ragged = drop_path(x_ragged, drop_prob, training=True, seed=3)
    jax.block_until_ready(out_ragged)
    assert out_ragged.shape == x_ragged.shape and out_ragged.dtype == x_ragged.dtype
    _check_droppath(x_ragged, out_ragged, keep_prob)

    # 4) bf16 activations: product computed in f32, only the result is cast to bf16.
    x_bf16 = x_ragged.astype(jnp.bfloat16)
    out_bf16 = drop_path(x_bf16, drop_prob, training=True, seed=3)
    jax.block_until_ready(out_bf16)
    assert out_bf16.shape == x_bf16.shape and out_bf16.dtype == jnp.bfloat16
    _check_droppath(x_bf16, out_bf16, keep_prob, rtol=2e-2, atol=1e-5)

    print("KERNEL_OK")
</pallas_src>

<mosaic_0001>
module attributes {stable_mosaic.version = 11 : i64} {
  func.func @_drop_path_scale_kernel(%arg0: i32, %arg1: i32, %arg2: memref<2x1024xf32, #tpu.memory_space<vmem>>, %arg3: memref<2x1xf32, #tpu.memory_space<vmem>>, %arg4: memref<2x1024xf32, #tpu.memory_space<vmem>>) attributes {dimension_semantics = [#tpu.dimension_semantics<parallel>, #tpu.dimension_semantics<parallel>], iteration_bounds = array<i64: 1, 1>, scalar_prefetch = 0 : i64, scratch_operands = 0 : i64, tpu.core_type = #tpu.core_type<tc>, window_params = [{transform_indices = @transform_0, window_bounds = array<i64: 2, 1024>}, {transform_indices = @transform_1, window_bounds = array<i64: 2, 1>}, {transform_indices = @transform_2, window_bounds = array<i64: 2, 1024>}]} {
    %c0 = arith.constant 0 : index
    %c0_0 = arith.constant 0 : index
    %0 = vector.load %arg2[%c0, %c0_0] : memref<2x1024xf32, #tpu.memory_space<vmem>>, vector<2x1024xf32>
    %c0_1 = arith.constant 0 : index
    %c0_2 = arith.constant 0 : index
    %1 = vector.load %arg3[%c0_1, %c0_2] : memref<2x1xf32, #tpu.memory_space<vmem>>, vector<2x1xf32>
    %2 = vector.broadcast %1 : vector<2x1xf32> to vector<2x1024xf32>
    %3 = arith.mulf %0, %2 : vector<2x1024xf32>
    %c0_3 = arith.constant 0 : index
    %c0_4 = arith.constant 0 : index
    %4 = vector.load %arg4[%c0_3, %c0_4] : memref<2x1024xf32, #tpu.memory_space<vmem>>, vector<2x1024xf32>
    tpu.vector_store %arg4[%c0_3, %c0_4], %3 {strides = array<i32>} : memref<2x1024xf32, #tpu.memory_space<vmem>>, vector<2x1024xf32>,
    return
  }
  func.func @transform_0(%arg0: i32, %arg1: i32) -> (i32, i32) {
    %c0_i32 = arith.constant 0 : i32
    return %arg0, %arg1 : i32, i32
  }
  func.func @transform_1(%arg0: i32, %arg1: i32) -> (i32, i32) {
    %c0_i32 = arith.constant 0 : i32
    %c0_i32_0 = arith.constant 0 : i32
    return %arg0, %c0_i32 : i32, i32
  }
  func.func @transform_2(%arg0: i32, %arg1: i32) -> (i32, i32) {
    %c0_i32 = arith.constant 0 : i32
    return %arg0, %arg1 : i32, i32
  }
}

</mosaic_0001>

<bundles_post_ra>
// kernel: tpu_custom_call.1
= control target key start
LH: loop header
LB: loop body
LE: loop exit
PB: predicated region body
PF: predicated region fallthrough
CT: control target
= control target key end

     0   :  { %7 = vsyncpa [#allocation3], 0  ;;  %s157_s0 = inlined_call_operand.hbm [shape: f32[2,1024], index: 0, kind: input, shape index: {}]   ;;  %s158_s1 = inlined_call_operand.vmem [shape: f32[2,1], index: 1, kind: input, shape index: {}]   ;;  %s159_s2 = inlined_call_operand.hbm [shape: f32[2,1024], index: 2, kind: output, shape index: {}]  }
   0x1   :  { %8 = vsyncpa [#allocation4], 0  ;;  %s111_s9 = smov [#allocation2]   ;;  %s63_s13 = scalar_lea.hbm %s157_s0, 256 }
   0x2   :  { %s15_s10 = sshll.u32 %s111_s9, 4  ;;  %p64_p0 = scmp.ne.s32.totalorder %s157_s0, %s63_s13  ;;  %s16_s10 = int_to_ptr.vmem [resolvable:$true] %s15_s10 }
   0x3   :  { %p67_p1 = scmp.lt.u32.totalorder %s63_s13, %s157_s0 }
   0x5   :  { %p69_p2 = pnand %p67_p1, %p64_p0 }
   0x7   :  { %72 = shalt.err (!%p69_p2)
}
   0x8   :  { %s73_s18 = scalar_lea.vmem %s16_s10, 256  ;;  %p78_p4 = scmp.lt.s32.totalorder %s16_s10, %s16_s10 }
   0x9   :  { %p74_p3 = scmp.ne.s32.totalorder %s16_s10, %s73_s18  ;;  %p79_p5 = scmp.lt.s32.totalorder %s73_s18, %s73_s18 }
   0xb   :  { %p80_p6 = por %p79_p5, %p78_p4 }
   0xd   :  { %p81_p7 = pnand %p80_p6, %p74_p3 }
   0xf   :  { %84 = shalt.err (!%p81_p7)
}
  0x10   :  { %18 = dma.hbm_to_vmem [thread:$0]  %s157_s0, 256, %s16_s10, [#allocation3]  }
  0x11   :  { %107 = dma.done.wait [#allocation3], 256  }
  0x12   :  { %108 = vsyncadd [#allocation3], 4294967040  ;;  %v112_v0 = vmov 0   ;;  %v26_v1 = vld [vmem:[%s158_s1] sm:$0x3]  ;;  %v34_v4 = vlaneseq  ;;  %v25_v10 = vld [vmem:[#allocation2 + $0x8] sm:$0xff] }
  0x13   :  { %62 = vset.pattern.permute.xlu0 %v112_v0  ;;  %v113_v2 = vmov 269488144   ;;  %v24_v9 = vld [vmem:[#allocation2] sm:$0xff]  ;;  %s114_s23 = smov [#allocation5]  }
  0x14   :  { %29 = vperm.xlu0 %62, %v26_v1   ;;  %v32_v3 = vunpack.c.l.s4 %v113_v2  ;;  %v35_v6 = vshrl.u32 %v34_v4, 7  ;;  %s49_s0 = sshll.u32 %s114_s23, 4  ;;  %s50_s0 = int_to_ptr.vmem [resolvable:$true] %s49_s0 }
  0x15   :  { %s85_s24 = scalar_lea.vmem %s50_s0, 256  ;;  %p90_p9 = scmp.lt.s32.totalorder %s50_s0, %s50_s0 }
  0x16   :  { %v33_v5 = vunpack.c.0.s8 %v32_v3  ;;  %p86_p8 = scmp.ne.s32.totalorder %s50_s0, %s85_s24  ;;  %p91_p10 = scmp.lt.s32.totalorder %s85_s24, %s85_s24 }
  0x18   :  { %v36_v7 = vsub.s32 %v33_v5, %v35_v6  ;;  %p92_p11 = por %p91_p10, %p90_p9 }
  0x1a   :  { %p93_p12 = pnand %p92_p11, %p86_p8 }
  0x93   :  { %v30_v8 = vpop.permute.xlu0 %29 }
  0x94   :  { %v37_v11 = vrot.slane %v30_v8, %v36_v7 }
  0x96   :  { %v39_v12 = vmul.f32 %v37_v11, %v24_v9  ;;  %v40_v13 = vmul.f32 %v37_v11, %v25_v10 }
  0x98   :  { %41 = vst [vmem:[#allocation5] sm:$0xff] %v39_v12  ;;  %42 = vst [vmem:[#allocation5 + $0x8] sm:$0xff] %v40_v13 }
  0x99   :  { %96 = shalt.err (!%p93_p12)
}
  0x9a   :  { %s97_s26 = scalar_lea.hbm %s159_s2, 256 }
  0x9b   :  { %p98_p13 = scmp.ne.s32.totalorder %s159_s2, %s97_s26  ;;  %p101_p0 = scmp.lt.u32.totalorder %s97_s26, %s159_s2 }
  0x9d   :  { %p103_p1 = pnand %p101_p0, %p98_p13 }
  0x9f   :  { %106 = shalt.err (!%p103_p1)
}
  0xa0   :  { %52 = dma.vmem_to_hbm [thread:$0]  %s50_s0, 256, %s159_s2, [#allocation4]  }
  0xa1   :  { %109 = dma.done.wait [#allocation4], 256  }
  0xa2   :  { %110 = vsyncadd [#allocation4], 4294967040 }
  0xa3   :  { %56 = vsyncpa [#allocation3], 1 }
  0xa4   :  { %57 = vsyncpa [#allocation4], 1 }

</bundles_post_ra>
